<compile_context>
chip_gen: v6e
topology: v6e:2x2x1
jax: 0.10.0
libtpu: 0.0.40
codegen_flags: <defaults>
</compile_context>

<pallas_src>
import jax
import jax.numpy as jnp
from jax.experimental import pallas as pl
from jax.experimental.pallas import tpu as pltpu

_LANES = 128
_SUBLANES = 8


def _round_up(n, m):
    return ((n + m - 1) // m) * m


def _pick_vmem_limit_bytes():
    """Per-generation scoped-VMEM limit: generous on 128 MiB v5e/v6e, safe on 64 MiB v7x."""
    cap = None
    try:
        cap = pltpu.get_tpu_info().vmem_capacity_bytes
    except Exception:
        cap = None
    if cap is None:
        try:
            kind = jax.devices()[0].device_kind.lower()
            cap = 64 * 1024 * 1024 if "v7" in kind else 128 * 1024 * 1024
        except Exception:
            cap = 64 * 1024 * 1024
    if cap >= 128 * 1024 * 1024:
        return 96 * 1024 * 1024          # v5e / v6e
    return 40 * 1024 * 1024              # v7x (64 MiB per TC): leave compiler-scratch headroom


def linear_kernel(x_ref, wt_ref, b_ref, o_ref):
    # x_ref:  (TB, D_in)     batch tile
    # wt_ref: (D_in, D_out)  VMEM-resident weight, already transposed once in the wrapper
    # b_ref:  (1, D_out)     VMEM-resident bias row
    # o_ref:  (TB, D_out)    output tile (last dim == full array dim, no lane padding)
    acc = jnp.dot(x_ref[...], wt_ref[...], preferred_element_type=jnp.float32)
    o_ref[...] = (acc + b_ref[...]).astype(o_ref.dtype)


def logistic_regression_forward(x, weight, bias, *, tile_b=4096, use_pallas=None):
    """y = x @ weight.T + bias, identical to torch.nn.Linear forward.

    x:      (B, D_in) float32
    weight: (D_out, D_in) float32   (PyTorch layout)
    bias:   (D_out,) float32
    """
    B, D_in = x.shape
    D_out = weight.shape[0]

    # Tiny problems: pallas_call fixed overhead dominates; XLA's fused GEMM wins.
    if use_pallas is None:
        use_pallas = B >= 256
    if not use_pallas:
        return x @ weight.T + bias

    # One-time (tiny) parameter reshapes; in real training code these would be cached.
    wt = weight.T                      # (D_in, D_out): plain (1,0) contraction, no in-kernel transpose
    b_row = bias.reshape(1, D_out)

    # --- choose batch tile against a per-generation VMEM budget ---------------
    vmem_limit = _pick_vmem_limit_bytes()
    budget = int(vmem_limit * 0.85)    # headroom for Mosaic internal scratch

    lanes_in = _round_up(D_in, _LANES)       # VMEM lane padding of narrow dims
    lanes_out = _round_up(D_out, _LANES)
    # x tile + out tile, double-buffered, f32:
    bytes_per_row = 2 * 4 * (lanes_in + lanes_out)
    # resident W^T + bias (default double-buffered), f32, (8,128)-tile padded:
    bytes_resident = 2 * 4 * (_round_up(D_in, _SUBLANES) * lanes_out
                              + _SUBLANES * lanes_out)

    rows_fit = (budget - bytes_resident) // max(bytes_per_row, 1)
    rows_fit = max(_SUBLANES, (rows_fit // _SUBLANES) * _SUBLANES)

    # >=2 grid steps whenever possible so ("parallel",) can shard across both v7x TCs.
    tb_cap_from_b = _round_up(max(pl.cdiv(B, 2), _SUBLANES), _SUBLANES)

    TB = max(_SUBLANES, min(tile_b, rows_fit, tb_cap_from_b))
    TB = (TB // _SUBLANES) * _SUBLANES

    grid = (pl.cdiv(B, TB),)           # partial last block is masked by Pallas; no jnp.pad of x

    flops = 2 * B * D_in * D_out
    bytes_accessed = 4 * (B * D_in + D_in * D_out + D_out + B * D_out)

    out = pl.pallas_call(
        linear_kernel,
        out_shape=jax.ShapeDtypeStruct((B, D_out), x.dtype),
        grid_spec=pltpu.PrefetchScalarGridSpec(
            num_scalar_prefetch=0,
            grid=grid,
            in_specs=[
                pl.BlockSpec((TB, D_in), lambda i: (i, 0)),    # batch tile
                pl.BlockSpec((D_in, D_out), lambda i: (0, 0)),  # resident W^T
                pl.BlockSpec((1, D_out), lambda i: (0, 0)),     # resident bias row
            ],
            out_specs=pl.BlockSpec((TB, D_out), lambda i: (i, 0)),
        ),
        compiler_params=pltpu.CompilerParams(
            dimension_semantics=("parallel",),     # megacore sharding on v7x
            vmem_limit_bytes=vmem_limit,
        ),
        cost_estimate=pl.CostEstimate(
            flops=flops, transcendentals=0, bytes_accessed=bytes_accessed,
        ),
    )(x, wt, b_row)

    return out


if __name__ == "__main__":
    # Small shapes consistent with LogisticRegression(input_dim, output_dim)
    batch, input_dim, output_dim = 8, 32, 16

    key = jax.random.PRNGKey(0)
    kx, kw, kb = jax.random.split(key, 3)

    # Deterministic PyTorch-style init: U(-1/sqrt(in_dim), 1/sqrt(in_dim))
    bound = 1.0 / jnp.sqrt(jnp.float32(input_dim))
    weight = jax.random.uniform(
        kw, (output_dim, input_dim), jnp.float32, minval=-bound, maxval=bound
    )
    bias = jax.random.uniform(
        kb, (output_dim,), jnp.float32, minval=-bound, maxval=bound
    )
    x = jax.random.normal(kx, (batch, input_dim), jnp.float32)
    y_ref = x @ weight.T + bias

    # 1) Force the Pallas kernel at the small test shape (auto-dispatch would fall back).
    y = jax.block_until_ready(logistic_regression_forward(x, weight, bias, use_pallas=True))
    assert y.shape == (batch, output_dim)
    assert jnp.allclose(y, y_ref, atol=1e-5, rtol=1e-5)

    # 2) Ragged batch smaller than one tile (partial-block masking on a 1-step grid).
    x2 = jax.random.normal(jax.random.PRNGKey(1), (5, input_dim), jnp.float32)
    y2 = jax.block_until_ready(logistic_regression_forward(x2, weight, bias, use_pallas=True))
    assert y2.shape == (5, output_dim)
    assert jnp.allclose(y2, x2 @ weight.T + bias, atol=1e-5, rtol=1e-5)

    # 3) Ragged batch spanning >=2 grid steps (partial last tile, megacore-shardable grid).
    x3 = jax.random.normal(jax.random.PRNGKey(2), (300, input_dim), jnp.float32)
    y3 = jax.block_until_ready(logistic_regression_forward(x3, weight, bias, use_pallas=True))
    assert y3.shape == (300, output_dim)
    assert jnp.allclose(y3, x3 @ weight.T + bias, atol=1e-5, rtol=1e-5)

    # 4) Auto-dispatch path (tiny problem -> fused XLA GEMM fallback).
    y4 = jax.block_until_ready(logistic_regression_forward(x, weight, bias))
    assert jnp.allclose(y4, y_ref, atol=1e-5, rtol=1e-5)

    print("KERNEL_OK")
</pallas_src>

<mosaic_0001>
module attributes {stable_mosaic.version = 11 : i64} {
  func.func @linear_kernel(%arg0: i32, %arg1: memref<8x32xf32, #tpu.memory_space<vmem>>, %arg2: memref<32x16xf32, #tpu.memory_space<vmem>>, %arg3: memref<1x16xf32, #tpu.memory_space<vmem>>, %arg4: memref<8x16xf32, #tpu.memory_space<vmem>>) attributes {dimension_semantics = [#tpu.dimension_semantics<parallel>], iteration_bounds = array<i64: 1>, scalar_prefetch = 0 : i64, scratch_operands = 0 : i64, tpu.core_type = #tpu.core_type<tc>, window_params = [{transform_indices = @transform_0, window_bounds = array<i64: 8, 32>}, {pipeline_mode = #tpu.pipeline_mode<synchronous>, transform_indices = @transform_1, window_bounds = array<i64: 32, 16>}, {pipeline_mode = #tpu.pipeline_mode<synchronous>, transform_indices = @transform_2, window_bounds = array<i64: 1, 16>}, {transform_indices = @transform_3, window_bounds = array<i64: 8, 16>}]} {
    %c0 = arith.constant 0 : index
    %c0_0 = arith.constant 0 : index
    %0 = vector.load %arg1[%c0, %c0_0] : memref<8x32xf32, #tpu.memory_space<vmem>>, vector<8x32xf32>
    %c0_1 = arith.constant 0 : index
    %c0_2 = arith.constant 0 : index
    %1 = vector.load %arg2[%c0_1, %c0_2] : memref<32x16xf32, #tpu.memory_space<vmem>>, vector<32x16xf32>
    %cst = arith.constant dense<0.000000e+00> : vector<8x16xf32>
    %2 = tpu.matmul %0, %1, %cst {dimension_numbers = #tpu.dot_dimension_numbers<[1], [0], [0], [1], [0, 0, 1, 1], [], []>} : vector<8x32xf32>, vector<32x16xf32>, vector<8x16xf32> -> vector<8x16xf32>
    %c0_3 = arith.constant 0 : index
    %c0_4 = arith.constant 0 : index
    %3 = vector.load %arg3[%c0_3, %c0_4] : memref<1x16xf32, #tpu.memory_space<vmem>>, vector<1x16xf32>
    %4 = vector.broadcast %3 : vector<1x16xf32> to vector<8x16xf32>
    %5 = arith.addf %2, %4 : vector<8x16xf32>
    %c0_5 = arith.constant 0 : index
    %c0_6 = arith.constant 0 : index
    %6 = vector.load %arg4[%c0_5, %c0_6] : memref<8x16xf32, #tpu.memory_space<vmem>>, vector<8x16xf32>
    tpu.vector_store %arg4[%c0_5, %c0_6], %5 {strides = array<i32>} : memref<8x16xf32, #tpu.memory_space<vmem>>, vector<8x16xf32>,
    return
  }
  func.func @transform_0(%arg0: i32) -> (i32, i32) {
    %c0_i32 = arith.constant 0 : i32
    %c0_i32_0 = arith.constant 0 : i32
    return %arg0, %c0_i32 : i32, i32
  }
  func.func @transform_1(%arg0: i32) -> (i32, i32) {
    %c0_i32 = arith.constant 0 : i32
    %c0_i32_0 = arith.constant 0 : i32
    %c0_i32_1 = arith.constant 0 : i32
    return %c0_i32, %c0_i32_0 : i32, i32
  }
  func.func @transform_2(%arg0: i32) -> (i32, i32) {
    %c0_i32 = arith.constant 0 : i32
    %c0_i32_0 = arith.constant 0 : i32
    %c0_i32_1 = arith.constant 0 : i32
    return %c0_i32, %c0_i32_0 : i32, i32
  }
  func.func @transform_3(%arg0: i32) -> (i32, i32) {
    %c0_i32 = arith.constant 0 : i32
    %c0_i32_0 = arith.constant 0 : i32
    return %arg0, %c0_i32 : i32, i32
  }
}

</mosaic_0001>

<bundles_post_ra>
// kernel: tpu_custom_call.1
= control target key start
LH: loop header
LB: loop body
LE: loop exit
PB: predicated region body
PF: predicated region fallthrough
CT: control target
= control target key end

     0   :  { %v160_v1 = vmov 0.0   ;;  %vm161_vm0 = vmmov 0   ;;  %s204_s0 = inlined_call_operand.vmem [shape: f32[8,32], index: 0, kind: input, shape index: {}]   ;;  %s205_s1 = inlined_call_operand.vmem [shape: f32[32,16], index: 1, kind: input, shape index: {}]   ;;  %s206_s2 = inlined_call_operand.vmem [shape: f32[1,16], index: 2, kind: input, shape index: {}]   ;;  %s207_s3 = inlined_call_operand.hbm [shape: f32[8,16], index: 3, kind: output, shape index: {}]  }
   0x1   :  { %v19_v0 = vld [vmem:[%s205_s1 + $0x18] sm:$0xff]  ;;  %124 = vmatprep.subr.mxu0 %v160_v1  ;;  %v18_v2 = vld [vmem:[%s205_s1 + $0x10] sm:$0xff]  ;;  %132 = vmatprep.mubr.msk.f32.mxu0 %vm161_vm0, %v160_v1 }
   0x2   :  { %125 = vmatpush3.msra.mxu0 %v19_v0 }
   0x3   :  { %8 = vsyncpa [#allocation3], 0  ;;  %126 = vmatprep.subr.mxu0 %v160_v1  ;;  %v17_v3 = vld [vmem:[%s205_s1 + $0x8] sm:$0xff]  ;;  %v16_v4 = vld [vmem:[%s205_s1] sm:$0xff]  ;;  %vm27_vm1 = vcmask 261120   ;;  %s162_s24 = smov [#allocation2]  }
   0x4   :  { %127 = vmatpush3.msra.mxu0 %v18_v2  ;;  %v15_v5 = vld [vmem:[%s204_s0] sm:$0xff]  ;;  %s109_s25 = sshll.u32 %s162_s24, 4  ;;  %vm101_vm2 = vcmask 130048   ;;  %s110_s25 = int_to_ptr.vmem [resolvable:$true] %s109_s25 }
   0x5   :  { %128 = vmatprep.subr.mxu0 %v160_v1  ;;  %v117_v6 = vld [vmem:[%s206_s2] ss:$0 sm:$0xff]  ;;  %s138_s1 = scalar_lea.vmem %s110_s25, 128  ;;  %p143_p1 = scmp.lt.s32.totalorder %s110_s25, %s110_s25 }
   0x6   :  { %129 = vmatpush3.msra.mxu0 %v17_v3  ;;  %p139_p0 = scmp.ne.s32.totalorder %s110_s25, %s138_s1  ;;  %p144_p2 = scmp.lt.s32.totalorder %s138_s1, %s138_s1 }
   0x7   :  { %130 = vmatprep.subr.mxu0 %v160_v1 }
   0x8   :  { %131 = vmatpush3.msra.mxu0 %v16_v4  ;;  %p145_p3 = por %p144_p2, %p143_p1 }
   0x9   :  { %133 = vmatmul.mubr.msk.f32.vlgmr.msra.gmra.mxu0 %vm27_vm1, %v15_v5 }
   0xa   :  { %p146_p4 = pnand %p145_p3, %p139_p0 }
  0xc9   :  { %v97_v7 = vpop.f32.mrf.mxu0 }
  0xca   :  { %v98_v8 = vadd.f32 %v117_v6, %v97_v7 }
  0xcb   :  { %v134_v9 = vpop.f32.mrf.mxu0 }
  0xcc   :  { %102 = vst.msk [vmem:[#allocation2] sm:$0xff] %vm101_vm2, %v98_v8 }
  0xcd   :  { %149 = shalt.err (!%p146_p4)
}
  0xce   :  { %112 = dma.vmem_to_hbm [thread:$0]  %s110_s25, 128, %s207_s3, [#allocation3]  }
  0xcf   :  { %158 = dma.done.wait [#allocation3], 128  }
  0xd0   :  { %159 = vsyncadd [#allocation3], 4294967168 }
  0xd1   :  { %116 = vsyncpa [#allocation3], 1 }

</bundles_post_ra>
